<compile_context>
chip_gen: v7x
topology: tpu7x:2x2x1
jax: 0.10.0
libtpu: 0.0.40
codegen_flags: <defaults>
</compile_context>

<pallas_src>
import functools
import math

import jax
import jax.numpy as jnp
from jax import lax
from jax.experimental import pallas as pl
from jax.experimental.pallas import tpu as pltpu


def _round_up(x, m):
    return (x + m - 1) // m * m


# ----------------------------------------------------------------------------
# Tiled linear: y = x @ W^T   (x: (M, K), W: (N, K) PyTorch layout)
# ----------------------------------------------------------------------------
def _linear_kernel(x_ref, w_ref, o_ref, acc_ref):
    @pl.when(pl.program_id(2) == 0)
    def _():
        acc_ref[...] = jnp.zeros_like(acc_ref)

    # Operands stay in the input dtype (bf16 in production -> full MXU rate);
    # f32 accumulation.  Contract the shared K dim directly (no W^T tile).
    acc_ref[...] += lax.dot_general(
        x_ref[...], w_ref[...],
        dimension_numbers=(((1,), (1,)), ((), ())),
        preferred_element_type=jnp.float32,
    )

    @pl.when(pl.program_id(2) == pl.num_programs(2) - 1)
    def _():
        o_ref[...] = acc_ref[...].astype(o_ref.dtype)


def linear(x2d, w, *, tm_cap=512, tn_cap=512, tk_cap=512):
    """y = x2d @ w.T.  Tiles are either the full dim (small dims) or fixed
    512-aligned tiles; large non-divisible dims are zero-padded in the wrapper
    (exact along K) instead of falling back to an unaligned divisor or a
    VMEM-busting full-dim block."""
    M, K = x2d.shape
    N, K2 = w.shape
    assert K == K2
    tm = M if M <= tm_cap else tm_cap    # tm_cap: multiple of 8 (and 16 for bf16)
    tn = N if N <= tn_cap else tn_cap    # tn_cap: multiple of 128 (lane / MXU width)
    tk = K if K <= tk_cap else tk_cap    # tk_cap: multiple of 128
    Mp, Np, Kp = _round_up(M, tm), _round_up(N, tn), _round_up(K, tk)
    if (Mp, Kp) != (M, K):
        x2d = jnp.pad(x2d, ((0, Mp - M), (0, Kp - K)))
    if (Np, Kp) != (N, K):
        w = jnp.pad(w, ((0, Np - N), (0, Kp - K)))
    grid = (Mp // tm, Np // tn, Kp // tk)
    itemsize = x2d.dtype.itemsize
    # Explicit VMEM budget: double-buffered x/w/out blocks + f32 accumulator.
    vmem_est = 2 * (tm * tk + tk * tn + tm * tn) * itemsize + tm * tn * 4
    vmem_limit = max(32 * 1024 * 1024, min(64 * 1024 * 1024, 2 * vmem_est))
    out = pl.pallas_call(
        _linear_kernel,
        out_shape=jax.ShapeDtypeStruct((Mp, Np), x2d.dtype),
        grid_spec=pltpu.PrefetchScalarGridSpec(
            num_scalar_prefetch=0,
            grid=grid,
            in_specs=[
                pl.BlockSpec((tm, tk), lambda i, j, k: (i, k)),
                pl.BlockSpec((tn, tk), lambda i, j, k: (j, k)),
            ],
            out_specs=pl.BlockSpec((tm, tn), lambda i, j, k: (i, j)),
            scratch_shapes=[pltpu.VMEM((tm, tn), jnp.float32)],
        ),
        compiler_params=pltpu.CompilerParams(
            dimension_semantics=("parallel", "parallel", "arbitrary"),
            vmem_limit_bytes=vmem_limit,
        ),
        cost_estimate=pl.CostEstimate(
            flops=2 * Mp * Np * Kp,
            transcendentals=0,
            bytes_accessed=(Mp * Kp + Np * Kp + Mp * Np) * itemsize,
        ),
    )(x2d, w)
    if (Mp, Np) != (M, N):
        out = out[:M, :N]
    return out


# ----------------------------------------------------------------------------
# Grouped-query flash attention
#   q: (B*n_kv, group*S, hd)   k/v: (B*n_kv, T, hd)
# ----------------------------------------------------------------------------
def _gqa_flash_kernel(q_ref, k_ref, v_ref, o_ref,
                      qs_sc, m_sc, l_sc, acc_sc, *, scale, kv_len, tkv):
    t = pl.program_id(2)                       # KV-tile axis (innermost)
    ragged = (kv_len % tkv) != 0               # static: add masking only if needed

    @pl.when(t == 0)
    def _():
        # Scaled Q is invariant across the KV axis: compute it ONCE per
        # (bh, q-tile) into scratch instead of per KV tile.  Kept in the input
        # dtype so QK^T runs bf16 x bf16 -> f32 on the MXU in production.
        qs_sc[...] = q_ref[0] * scale
        m_sc[...] = jnp.full_like(m_sc, -jnp.inf)
        l_sc[...] = jnp.zeros_like(l_sc)
        acc_sc[...] = jnp.zeros_like(acc_sc)

    k = k_ref[0]                               # (tkv, hd), input dtype
    v = v_ref[0]                               # (tkv, hd), input dtype

    # scores = (q*scale) @ k^T, contracted on hd (no transposed K tile).
    s = lax.dot_general(
        qs_sc[...], k,
        dimension_numbers=(((1,), (1,)), ((), ())),
        preferred_element_type=jnp.float32,
    )                                          # (tq, tkv) f32

    if ragged:
        # Mask the ragged last KV tile (positions >= kv_len); also zero padded
        # V rows so garbage in the boundary block cannot reach the accumulator.
        kv_pos = t * tkv + lax.broadcasted_iota(jnp.int32, s.shape, 1)
        s = jnp.where(kv_pos < kv_len, s, -jnp.inf)
        v_valid = (t * tkv + lax.broadcasted_iota(jnp.int32, (v.shape[0], 1), 0)) < kv_len
        v = jnp.where(v_valid, v, jnp.zeros_like(v))

    m_prev = m_sc[...]
    m_new = jnp.maximum(m_prev, jnp.max(s, axis=-1, keepdims=True))
    alpha = jnp.exp(m_prev - m_new)
    p = jnp.exp(s - m_new)                     # unnormalized probs (f32)
    l_sc[...] = alpha * l_sc[...] + jnp.sum(p, axis=-1, keepdims=True)
    acc_sc[...] = alpha * acc_sc[...] + lax.dot_general(
        p.astype(v.dtype), v,
        dimension_numbers=(((1,), (0,)), ((), ())),
        preferred_element_type=jnp.float32,
    )
    m_sc[...] = m_new

    @pl.when(t == pl.num_programs(2) - 1)
    def _():
        # Normalize the (tq, hd) accumulator once; reciprocal on the EUP slot.
        inv_l = pl.reciprocal(l_sc[...], approx=True)
        o_ref[0] = (acc_sc[...] * inv_l).astype(o_ref.dtype)


def gqa_attention(q, k, v, *, tq_cap=256, tkv_cap=512):
    """q: (B*n_kv, group*S, hd); k, v: (B*n_kv, T, hd) -> (B*n_kv, group*S, hd)."""
    BH, Sg, hd = q.shape
    _, T, _ = k.shape
    scale = 1.0 / math.sqrt(hd)

    # Query-tile axis keeps VMEM O(tq*hd) for long prefill (v7x 64 MiB budget);
    # pad Sg (new tokens only, cheap) so every Q tile is full.
    tq = Sg if Sg <= tq_cap else tq_cap        # tq_cap: multiple of 8 (and 16)
    Sg_p = _round_up(Sg, tq)
    if Sg_p != Sg:
        q = jnp.pad(q, ((0, 0), (0, Sg_p - Sg), (0, 0)))

    # KV tiling: cdiv grid + in-kernel mask for the ragged tail — never copy or
    # pad the cache-backed K/V through HBM.
    tkv = T if T <= tkv_cap else tkv_cap       # tkv_cap: multiple of 8 & 128
    grid = (BH, Sg_p // tq, pl.cdiv(T, tkv))

    kernel = functools.partial(_gqa_flash_kernel, scale=scale, kv_len=T, tkv=tkv)
    itemsize = q.dtype.itemsize
    vmem_est = (2 * (2 * tq * hd + 2 * tkv * hd) * itemsize
                + (2 * tq * hd + 2 * tq) * 4)
    vmem_limit = max(32 * 1024 * 1024, min(64 * 1024 * 1024, 2 * vmem_est))
    # TODO(synk): on v7x, deepen KV pipelining with pipeline_mode=pl.Buffered(3)
    # on the K/V specs and consider an fp8 KV cache for long-context decode.
    out = pl.pallas_call(
        kernel,
        out_shape=jax.ShapeDtypeStruct((BH, Sg_p, hd), q.dtype),
        grid_spec=pltpu.PrefetchScalarGridSpec(
            num_scalar_prefetch=0,
            grid=grid,
            in_specs=[
                pl.BlockSpec((1, tq, hd), lambda b, i, t: (b, i, 0)),
                pl.BlockSpec((1, tkv, hd), lambda b, i, t: (b, t, 0)),
                pl.BlockSpec((1, tkv, hd), lambda b, i, t: (b, t, 0)),
            ],
            out_specs=pl.BlockSpec((1, tq, hd), lambda b, i, t: (b, i, 0)),
            scratch_shapes=[
                pltpu.VMEM((tq, hd), q.dtype),      # scaled Q (loop-invariant)
                pltpu.VMEM((tq, 1), jnp.float32),   # running max
                pltpu.VMEM((tq, 1), jnp.float32),   # running denom
                pltpu.VMEM((tq, hd), jnp.float32),  # output accumulator
            ],
        ),
        compiler_params=pltpu.CompilerParams(
            dimension_semantics=("parallel", "parallel", "arbitrary"),
            vmem_limit_bytes=vmem_limit,
        ),
        cost_estimate=pl.CostEstimate(
            flops=4 * BH * Sg_p * T * hd,
            transcendentals=BH * Sg_p * T,
            bytes_accessed=(2 * q.size + k.size + v.size) * itemsize,
        ),
    )(q, k, v)
    if Sg_p != Sg:
        out = out[:, :Sg]
    return out


# ----------------------------------------------------------------------------
# In-place KV-cache update (aliased output; only the new rows move through HBM)
#   cache layout: (B_max, n_kv, T_max, hd)
# ----------------------------------------------------------------------------
def _kv_cache_update_kernel(new_ref, cache_ref, out_ref, sem, *, start_pos):
    del cache_ref  # aliased to out_ref; only the new slab is written
    b = pl.program_id(0)
    h = pl.program_id(1)
    s_len = new_ref.shape[2]
    cp = pltpu.make_async_copy(
        new_ref.at[0, 0],
        out_ref.at[b, h, pl.ds(start_pos, s_len), :],
        sem,
    )
    cp.start()
    cp.wait()


def kv_cache_update(cache, new, *, start_pos):
    """Scatter `new` (B, n_kv, S, hd) into `cache` (B_max, n_kv, T_max, hd) at
    sequence offset `start_pos`, in place via input/output aliasing."""
    B, n_kv, S, hd = new.shape
    return pl.pallas_call(
        functools.partial(_kv_cache_update_kernel, start_pos=start_pos),
        out_shape=jax.ShapeDtypeStruct(cache.shape, cache.dtype),
        grid_spec=pltpu.PrefetchScalarGridSpec(
            num_scalar_prefetch=0,
            grid=(B, n_kv),
            in_specs=[
                pl.BlockSpec((1, 1, S, hd), lambda b, h: (b, h, 0, 0)),
                pl.BlockSpec(memory_space=pl.ANY),   # whole cache stays in HBM
            ],
            out_specs=pl.BlockSpec(memory_space=pl.ANY),
            scratch_shapes=[pltpu.SemaphoreType.DMA(())],
        ),
        input_output_aliases={1: 0},
        compiler_params=pltpu.CompilerParams(
            dimension_semantics=("arbitrary", "arbitrary"),
        ),
    )(new, cache)


# ----------------------------------------------------------------------------
# Plain-JAX glue (rotary embedding, reshapes)
# ----------------------------------------------------------------------------
def precompute_freqs(head_dim, positions, theta=10000.0):
    inv_freq = 1.0 / (theta ** (jnp.arange(0, head_dim, 2, dtype=jnp.float32) / head_dim))
    angles = positions[:, None].astype(jnp.float32) * inv_freq[None, :]  # (S, hd/2)
    return jnp.cos(angles), jnp.sin(angles)


def apply_rotary_embedding(x, cos, sin):
    # x: (B, S, H, hd); consecutive (even, odd) pairs form the complex components
    B, S, H, hd = x.shape
    xp = x.reshape(B, S, H, hd // 2, 2)
    x0, x1 = xp[..., 0], xp[..., 1]
    c = cos[None, :, None, :]
    s = sin[None, :, None, :]
    o0 = x0 * c - x1 * s
    o1 = x0 * s + x1 * c
    return jnp.stack([o0, o1], axis=-1).reshape(B, S, H, hd).astype(x.dtype)


def grouped_query_attention_forward(params, cache_k, cache_v, x, start_pos, cos, sin,
                                    n_heads, n_kv_heads, compute_dtype=None):
    """cache_k / cache_v layout: (max_batch, n_kv_heads, max_seq, head_dim)."""
    B, S, D = x.shape
    head_dim = D // n_heads
    group_size = n_heads // n_kv_heads
    dt = compute_dtype if compute_dtype is not None else x.dtype

    # Projections: bf16 operands in production (halve weight bytes, full MXU
    # rate); accumulation is f32 inside the kernel either way.
    # TODO(synk): in production store the weights directly in `dt` (bf16)
    # instead of casting per call.
    x2d = x.astype(dt).reshape(B * S, D)
    wq, wk, wv, wo = (params[n].astype(dt) for n in ("wq", "wk", "wv", "wo"))
    xq = linear(x2d, wq).reshape(B, S, n_heads, head_dim)
    xk = linear(x2d, wk).reshape(B, S, n_kv_heads, head_dim)
    xv = linear(x2d, wv).reshape(B, S, n_kv_heads, head_dim)

    # Reference module applies rotary to q, k AND v — reproduce exactly.
    xq = apply_rotary_embedding(xq, cos, sin)
    xk = apply_rotary_embedding(xk, cos, sin)
    xv = apply_rotary_embedding(xv, cos, sin)

    # KV-cache update: cache lives in (B_max, n_kv, T_max, hd), so only the S
    # new tokens are transposed, and the aliased Pallas scatter avoids copying
    # / transposing the whole cache through HBM every step.
    new_k = jnp.transpose(xk, (0, 2, 1, 3)).astype(cache_k.dtype)
    new_v = jnp.transpose(xv, (0, 2, 1, 3)).astype(cache_v.dtype)
    cache_k = kv_cache_update(cache_k, new_k, start_pos=start_pos)
    cache_v = kv_cache_update(cache_v, new_v, start_pos=start_pos)

    T = start_pos + S
    keys = cache_k[:B, :, :T].astype(dt)       # (B, n_kv, T, hd) — no transpose
    values = cache_v[:B, :, :T].astype(dt)

    # Group query heads per kv head, and fold (batch, kv-head) into one parallel
    # axis so both v7x TensorCores get work even at batch=1 decode.
    q = jnp.transpose(xq, (0, 2, 1, 3)).reshape(B * n_kv_heads, group_size * S, head_dim)
    k = keys.reshape(B * n_kv_heads, T, head_dim)
    v = values.reshape(B * n_kv_heads, T, head_dim)

    attn = gqa_attention(q, k, v)              # (B*n_kv, group*S, hd)
    attn = attn.reshape(B, n_heads, S, head_dim)
    attn = jnp.transpose(attn, (0, 2, 1, 3)).reshape(B * S, D)

    out = linear(attn, wo).reshape(B, S, D).astype(x.dtype)
    return out, cache_k, cache_v


# ----------------------------------------------------------------------------
# Pure-JAX reference for correctness check (original PyTorch cache layout)
# ----------------------------------------------------------------------------
def reference_forward(params, cache_k, cache_v, x, start_pos, cos, sin,
                      n_heads, n_kv_heads):
    B, S, D = x.shape
    head_dim = D // n_heads
    group_size = n_heads // n_kv_heads
    xq = (x @ params["wq"].T).reshape(B, S, n_heads, head_dim)
    xk = (x @ params["wk"].T).reshape(B, S, n_kv_heads, head_dim)
    xv = (x @ params["wv"].T).reshape(B, S, n_kv_heads, head_dim)
    xq = apply_rotary_embedding(xq, cos, sin)
    xk = apply_rotary_embedding(xk, cos, sin)
    xv = apply_rotary_embedding(xv, cos, sin)
    cache_k = cache_k.at[:B, start_pos:start_pos + S].set(xk)
    cache_v = cache_v.at[:B, start_pos:start_pos + S].set(xv)
    keys = jnp.repeat(cache_k[:B, : start_pos + S], group_size, axis=2)
    values = jnp.repeat(cache_v[:B, : start_pos + S], group_size, axis=2)
    q = jnp.transpose(xq, (0, 2, 1, 3))
    k = jnp.transpose(keys, (0, 2, 1, 3))
    v = jnp.transpose(values, (0, 2, 1, 3))
    scores = jnp.einsum("bhqd,bhkd->bhqk", q, k) / math.sqrt(head_dim)
    scores = jax.nn.softmax(scores.astype(jnp.float32), axis=-1).astype(q.dtype)
    out = jnp.einsum("bhqk,bhkd->bhqd", scores, v)
    out = jnp.transpose(out, (0, 2, 1, 3)).reshape(B, S, D)
    return out @ params["wo"].T


# ----------------------------------------------------------------------------
if __name__ == "__main__":
    # Small Llama3-ish config
    B, S, D = 2, 8, 32
    n_heads, n_kv_heads = 4, 2
    head_dim = D // n_heads
    max_batch, max_seq = 2, 16
    start_pos = 0

    key = jax.random.PRNGKey(0)
    kx, kq, kk, kvk, ko = jax.random.split(key, 5)
    wscale = 1.0 / math.sqrt(D)
    params = {
        "wq": jax.random.normal(kq, (D, D), jnp.float32) * wscale,
        "wk": jax.random.normal(kk, (n_kv_heads * head_dim, D), jnp.float32) * wscale,
        "wv": jax.random.normal(kvk, (n_kv_heads * head_dim, D), jnp.float32) * wscale,
        "wo": jax.random.normal(ko, (D, D), jnp.float32) * wscale,
    }
    x = jax.random.normal(kx, (B, S, D), jnp.float32)

    positions = jnp.arange(start_pos, start_pos + S)
    cos, sin = precompute_freqs(head_dim, positions)

    # Kernel-path KV cache lives in (B_max, n_kv, T_max, hd) layout.
    cache_k = jnp.zeros((max_batch, n_kv_heads, max_seq, head_dim), jnp.float32)
    cache_v = jnp.zeros((max_batch, n_kv_heads, max_seq, head_dim), jnp.float32)

    out, new_ck, new_cv = grouped_query_attention_forward(
        params, cache_k, cache_v, x, start_pos, cos, sin, n_heads, n_kv_heads
    )
    out = jax.block_until_ready(out)

    # Pure-JAX reference (original (B_max, T_max, n_kv, hd) cache layout).
    ref_ck = jnp.zeros((max_batch, max_seq, n_kv_heads, head_dim), jnp.float32)
    ref_cv = jnp.zeros((max_batch, max_seq, n_kv_heads, head_dim), jnp.float32)
    ref = reference_forward(params, ref_ck, ref_cv, x, start_pos, cos, sin,
                            n_heads, n_kv_heads)

    assert out.shape == (B, S, D)
    # approx reciprocal at finalize -> slightly looser tolerance than exact f32
    assert jnp.allclose(out, ref, atol=5e-3, rtol=5e-3), "f32 mismatch vs reference"

    # Check the in-place cache scatter landed in the right place (and nowhere else).
    xk_ref = apply_rotary_embedding(
        (x @ params["wk"].T).reshape(B, S, n_kv_heads, head_dim), cos, sin)
    expect_ck = jnp.zeros_like(cache_k).at[:B, :, start_pos:start_pos + S].set(
        jnp.transpose(xk_ref, (0, 2, 1, 3)))
    assert jnp.allclose(new_ck, expect_ck, atol=5e-3, rtol=5e-3), "cache scatter mismatch"

    # Production-style bf16 compute path (bf16 operands, f32 accumulation).
    cache_k2 = jnp.zeros_like(cache_k)
    cache_v2 = jnp.zeros_like(cache_v)
    out_bf16, _, _ = grouped_query_attention_forward(
        params, cache_k2, cache_v2, x, start_pos, cos, sin, n_heads, n_kv_heads,
        compute_dtype=jnp.bfloat16,
    )
    out_bf16 = jax.block_until_ready(out_bf16)
    assert out_bf16.shape == (B, S, D)
    assert bool(jnp.max(jnp.abs(out_bf16.astype(jnp.float32) - ref)) < 0.25), \
        "bf16 path diverged"

    print("KERNEL_OK")
</pallas_src>

<mosaic_0001>
module attributes {stable_mosaic.version = 11 : i64} {
  func.func @_linear_kernel(%arg0: i32, %arg1: i32, %arg2: i32, %arg3: memref<16x32xf32, #tpu.memory_space<vmem>>, %arg4: memref<32x32xf32, #tpu.memory_space<vmem>>, %arg5: memref<16x32xf32, #tpu.memory_space<vmem>>, %arg6: memref<16x32xf32, #tpu.memory_space<vmem>>) attributes {dimension_semantics = [#tpu.dimension_semantics<parallel>, #tpu.dimension_semantics<parallel>, #tpu.dimension_semantics<arbitrary>], iteration_bounds = array<i64: 1, 1, 1>, scalar_prefetch = 0 : i64, scratch_operands = 1 : i64, tpu.core_type = #tpu.core_type<tc>, window_params = [{transform_indices = @transform_0, window_bounds = array<i64: 16, 32>}, {transform_indices = @transform_1, window_bounds = array<i64: 32, 32>}, {transform_indices = @transform_2, window_bounds = array<i64: 16, 32>}]} {
    %c0_i32 = arith.constant 0 : i32
    %0 = arith.cmpi eq, %arg2, %c0_i32 : i32
    %1 = arith.extui %0 : i1 to i32
    %c0_i32_0 = arith.constant 0 : i32
    %2 = arith.cmpi ne, %1, %c0_i32_0 : i32
    scf.if %2 {
      %cst_10 = arith.constant 0.000000e+00 : f32
      %12 = vector.broadcast %cst_10 : f32 to vector<16x32xf32>
      %c0_11 = arith.constant 0 : index
      %c0_12 = arith.constant 0 : index
      %13 = vector.load %arg6[%c0_11, %c0_12] : memref<16x32xf32, #tpu.memory_space<vmem>>, vector<16x32xf32>
      tpu.vector_store %arg6[%c0_11, %c0_12], %12 {strides = array<i32>} : memref<16x32xf32, #tpu.memory_space<vmem>>, vector<16x32xf32>,
    } else {
    }
    %c0 = arith.constant 0 : index
    %c0_1 = arith.constant 0 : index
    %3 = vector.load %arg6[%c0, %c0_1] : memref<16x32xf32, #tpu.memory_space<vmem>>, vector<16x32xf32>
    %c0_2 = arith.constant 0 : index
    %c0_3 = arith.constant 0 : index
    %4 = vector.load %arg3[%c0_2, %c0_3] : memref<16x32xf32, #tpu.memory_space<vmem>>, vector<16x32xf32>
    %c0_4 = arith.constant 0 : index
    %c0_5 = arith.constant 0 : index
    %5 = vector.load %arg4[%c0_4, %c0_5] : memref<32x32xf32, #tpu.memory_space<vmem>>, vector<32x32xf32>
    %cst = arith.constant dense<0.000000e+00> : vector<16x32xf32>
    %6 = tpu.matmul %4, %5, %cst {dimension_numbers = #tpu.dot_dimension_numbers<[1], [1], [0], [0], [0, 0, 1, 0], [], []>} : vector<16x32xf32>, vector<32x32xf32>, vector<16x32xf32> -> vector<16x32xf32>
    %7 = arith.addf %3, %6 : vector<16x32xf32>
    %c0_6 = arith.constant 0 : index
    %c0_7 = arith.constant 0 : index
    %8 = vector.load %arg6[%c0_6, %c0_7] : memref<16x32xf32, #tpu.memory_space<vmem>>, vector<16x32xf32>
    tpu.vector_store %arg6[%c0_6, %c0_7], %7 {strides = array<i32>} : memref<16x32xf32, #tpu.memory_space<vmem>>, vector<16x32xf32>,
    %c0_i32_8 = arith.constant 0 : i32
    %9 = arith.cmpi eq, %arg2, %c0_i32_8 : i32
    %10 = arith.extui %9 : i1 to i32
    %c0_i32_9 = arith.constant 0 : i32
    %11 = arith.cmpi ne, %10, %c0_i32_9 : i32
    scf.if %11 {
      %c0_10 = arith.constant 0 : index
      %c0_11 = arith.constant 0 : index
      %12 = vector.load %arg6[%c0_10, %c0_11] : memref<16x32xf32, #tpu.memory_space<vmem>>, vector<16x32xf32>
      %c0_12 = arith.constant 0 : index
      %c0_13 = arith.constant 0 : index
      %13 = vector.load %arg5[%c0_12, %c0_13] : memref<16x32xf32, #tpu.memory_space<vmem>>, vector<16x32xf32>
      tpu.vector_store %arg5[%c0_12, %c0_13], %12 {strides = array<i32>} : memref<16x32xf32, #tpu.memory_space<vmem>>, vector<16x32xf32>,
    } else {
    }
    return
  }
  func.func @transform_0(%arg0: i32, %arg1: i32, %arg2: i32) -> (i32, i32) {
    %c0_i32 = arith.constant 0 : i32
    return %arg0, %arg2 : i32, i32
  }
  func.func @transform_1(%arg0: i32, %arg1: i32, %arg2: i32) -> (i32, i32) {
    %c0_i32 = arith.constant 0 : i32
    return %arg1, %arg2 : i32, i32
  }
  func.func @transform_2(%arg0: i32, %arg1: i32, %arg2: i32) -> (i32, i32) {
    %c0_i32 = arith.constant 0 : i32
    return %arg0, %arg1 : i32, i32
  }
}

</mosaic_0001>

<bundles_post_ra>
// kernel: tpu_custom_call.1
= control target key start
LH: loop header
LB: loop body
LE: loop exit
PB: predicated region body
PF: predicated region fallthrough
CT: control target
= control target key end

     0   :  { %7 = vsyncpa [#allocation4], 0  ;;  %s367_s0 = inlined_call_operand.hbm [shape: f32[16,32], index: 0, kind: input, shape index: {}]   ;;  %s368_s1 = inlined_call_operand.hbm [shape: f32[32,32], index: 1, kind: input, shape index: {}]   ;;  %s369_s2 = inlined_call_operand.hbm [shape: f32[16,32], index: 2, kind: output, shape index: {}]  }
   0x1   :  { %8 = vsyncpa [#allocation7], 0 }
   0x2   :  { %9 = vsyncpa [#allocation5], 0  ;;  %s291_s9 = smov [#allocation3]   ;;  %s219_s13 = scalar_lea.hbm %s367_s0, 256 }
   0x3   :  { %s15_s10 = sshll.u32 %s291_s9, 4  ;;  %p220_p0 = scmp.ne.s32.totalorder %s367_s0, %s219_s13  ;;  %s16_s10 = int_to_ptr.vmem [resolvable:$true] %s15_s10 }
   0x4   :  { %p223_p1 = scmp.lt.u32.totalorder %s219_s13, %s367_s0 }
   0x6   :  { %p225_p2 = pnand %p223_p1, %p220_p0 }
   0x8   :  { %228 = shalt.err (!%p225_p2)
}
   0x9   :  { %s229_s18 = scalar_lea.vmem %s16_s10, 256  ;;  %p234_p4 = scmp.lt.s32.totalorder %s16_s10, %s16_s10 }
   0xa   :  { %p230_p3 = scmp.ne.s32.totalorder %s16_s10, %s229_s18  ;;  %p235_p5 = scmp.lt.s32.totalorder %s229_s18, %s229_s18 }
   0xc   :  { %p236_p6 = por %p235_p5, %p234_p4 }
   0xe   :  { %p237_p7 = pnand %p236_p6, %p230_p3 }
  0x10   :  { %240 = shalt.err (!%p237_p7)
}
  0x11   :  { %s292_s19 = smov 128   ;;  %s293_s20 = smov 8  }
  0x12   :  { %21 = dma.hbm_to_vmem [thread:$0]  %s367_s0, 256, %s16_s10, [#allocation4], %s292_s19, %s292_s19, %s293_s20  }
  0x13   :  { %s294_s23 = smov [#allocation6]   ;;  %s241_s27 = scalar_lea.hbm %s368_s1, 512 }
  0x14   :  { %s27_s24 = sshll.u32 %s294_s23, 4  ;;  %p242_p8 = scmp.ne.s32.totalorder %s368_s1, %s241_s27  ;;  %s28_s24 = int_to_ptr.vmem [resolvable:$true] %s27_s24 }
  0x15   :  { %p245_p9 = scmp.lt.u32.totalorder %s241_s27, %s368_s1 }
  0x17   :  { %p247_p10 = pnand %p245_p9, %p242_p8 }
  0x19   :  { %250 = shalt.err (!%p247_p10)
}
  0x1a   :  { %s251_s4 = scalar_lea.vmem %s28_s24, 512  ;;  %p256_p12 = scmp.lt.s32.totalorder %s28_s24, %s28_s24 }
  0x1b   :  { %p252_p11 = scmp.ne.s32.totalorder %s28_s24, %s251_s4  ;;  %p257_p13 = scmp.lt.s32.totalorder %s251_s4, %s251_s4 }
  0x1d   :  { %p258_p0 = por %p257_p13, %p256_p12 }
  0x1f   :  { %p259_p1 = pnand %p258_p0, %p252_p11 }
  0x21   :  { %262 = shalt.err (!%p259_p1)
}
  0x22   :  { %33 = dma.hbm_to_vmem [thread:$0]  %s368_s1, 512, %s28_s24, [#allocation7], %s292_s19, %s292_s19, %s293_s20  }
  0x23   :  { %285 = dma.done.wait [#allocation4], 256  }
  0x24   :  { %286 = vsyncadd [#allocation4], 4294967040 }
  0x25   :  { %287 = dma.done.wait [#allocation7], 512  }
  0x26   :  { %288 = vsyncadd [#allocation7], 4294966784  ;;  %vm44_vm0 = vcmask 261120   ;;  %v295_v0 = vmov 0.0   ;;  %v51_v1 = vld [vmem:[#allocation6] sm:$0xff]  ;;  %v52_v2 = vld [vmem:[#allocation6 + $0x8] sm:$0xff] }
  0x27   :  { %46 = vst.msk [vmem:[#allocation2 + $0x8] sm:$0xff] %vm44_vm0, %v295_v0  ;;  %45 = vst.msk [vmem:[#allocation2] sm:$0xff] %vm44_vm0, %v295_v0  ;;  %v53_v3 = vld [vmem:[#allocation6 + $0x10] sm:$0xff]  ;;  %v201_v4 = vpack.c.bf16 %v52_v2, %v51_v1  ;;  %v54_v5 = vld [vmem:[#allocation6 + $0x18] sm:$0xff]  ;;  %s296_s1 = smov [#allocation8]  }
  0x28   :  { %vm202_vm1 = vmpackc.low %vm44_vm0, %vm44_vm0  ;;  %v49_v6 = vld [vmem:[#allocation3] sm:$0xff]  ;;  %v207_v7 = vpack.c.bf16 %v54_v5, %v53_v3  ;;  %v50_v8 = vld [vmem:[#allocation3 + $0x8] sm:$0xff]  ;;  %s165_s6 = sshll.u32 %s296_s1, 4  ;;  %s166_s6 = int_to_ptr.vmem [resolvable:$true] %s165_s6 }
  0x29   :  { %198 = vmatprep.mubr.msk.f32.mxu0 %vm44_vm0, %v49_v6  ;;  %203 = vmatprep.subr.msk.bf16.mxu0 %vm202_vm1, %v201_v4  ;;  %s263_s7 = scalar_lea.vmem %s166_s6, 256  ;;  %p268_p3 = scmp.lt.s32.totalorder %s166_s6, %s166_s6 }
  0x2a   :  { %206 = vmatpush3.bf16.xpose.msk.msra.mxu0 %vm202_vm1, %v201_v4  ;;  %p264_p2 = scmp.ne.s32.totalorder %s166_s6, %s263_s7  ;;  %p269_p4 = scmp.lt.s32.totalorder %s263_s7, %s263_s7 }
  0x2b   :  { %209 = vmatprep.subr.msk.bf16.mxu0 %vm202_vm1, %v207_v7 }
  0x2c   :  { %p270_p5 = por %p269_p4, %p268_p3 }
  0x2e   :  { %v48_v9 = vld [vmem:[#allocation2 + $0x8] sm:$0xff]  ;;  %v47_v10 = vld [vmem:[#allocation2] sm:$0xff]  ;;  %p271_p6 = pnand %p270_p5, %p264_p2 }
  0x32   :  { %212 = vmatpush3.bf16.xpose.msk.msra.mxu0 %vm202_vm1, %v207_v7 }
  0x39   :  { %199 = vmatmul.mubr.msk.f32.vlgmr.msra.gmra.mrb[0].mxu0 %vm44_vm0, %v50_v8 }
 0x10c   :  { %v200_v11 = vpop.f32.mrb[0].mxu0 }
 0x10d   :  { %v150_v12 = vadd.f32 %v200_v11, %v48_v9  ;;  %v140_v13 = vpop.f32.mrb[1].mxu0 }
 0x10e   :  { %v149_v14 = vadd.f32 %v140_v13, %v47_v10 }
 0x10f   :  { %152 = vst.msk [vmem:[#allocation2 + $0x8] sm:$0xff] %vm44_vm0, %v150_v12 }
 0x110   :  { %151 = vst.msk [vmem:[#allocation2] sm:$0xff] %vm44_vm0, %v149_v14 }
 0x116   :  { %v157_v15 = vld [vmem:[#allocation2 + $0x8] sm:$0xff] }
 0x117   :  { %v156_v16 = vld [vmem:[#allocation2] sm:$0xff]  ;;  %159 = vst.msk [vmem:[#allocation8 + $0x8] sm:$0xff] %vm44_vm0, %v157_v15 }
 0x118   :  { %158 = vst.msk [vmem:[#allocation8] sm:$0xff] %vm44_vm0, %v156_v16 }
 0x119   :  { %274 = shalt.err (!%p271_p6)
}
 0x11a   :  { %s275_s10 = scalar_lea.hbm %s369_s2, 256 }
 0x11b   :  { %p276_p7 = scmp.ne.s32.totalorder %s369_s2, %s275_s10  ;;  %p279_p8 = scmp.lt.u32.totalorder %s275_s10, %s369_s2 }
 0x11d   :  { %p281_p9 = pnand %p279_p8, %p276_p7 }
 0x11f   :  { %284 = shalt.err (!%p281_p9)
}
 0x120   :  { %171 = dma.vmem_to_hbm [thread:$0]  %s166_s6, 256, %s369_s2, [#allocation5], %s292_s19, %s292_s19, %s293_s20  }
 0x121   :  { %289 = dma.done.wait [#allocation5], 256  }
 0x122   :  { %290 = vsyncadd [#allocation5], 4294967040 }
 0x123   :  { %175 = vsyncpa [#allocation4], 1 }
 0x124   :  { %176 = vsyncpa [#allocation7], 1 }
 0x125   :  { %177 = vsyncpa [#allocation5], 1 }

</bundles_post_ra>
